<compile_context>
chip_gen: v7x
topology: tpu7x:2x2x1
jax: 0.10.0
libtpu: 0.0.40
codegen_flags: <defaults>
</compile_context>

<pallas_src>
import functools
import math

import jax
import jax.numpy as jnp
from jax import lax
from jax.experimental import pallas as pl
from jax.experimental.pallas import tpu as pltpu

_EPS = 1e-5                       # nn.BatchNorm1d default
_LANES = 128                      # vreg lane width
_FUSED_MAX_BYTES = 512 * 1024     # inputs at/below this stay fully VMEM-resident


def _round_up(a, m):
    return (a + m - 1) // m * m


# --------------------------------------------------------------------------
# Fused kernel (small inputs): stats + normalize in one body, x read once.
# --------------------------------------------------------------------------
def _bn_fused_kernel(x_ref, gamma_ref, beta_ref, o_ref, *, inv_n, pack, feat):
    x = x_ref[...].astype(jnp.float32)                   # (Np, Dp)
    s = jnp.sum(x, axis=0, keepdims=True)                # (1, Dp) per-lane partials
    sq = jnp.sum(x * x, axis=0, keepdims=True)           # (1, Dp)

    # Fold the `pack` lane chunks so every lane holds the full per-feature total
    # (cyclic rolls by multiples of `feat` sum all chunk cosets -> replicated).
    tot_s, tot_sq = s, sq
    for c in range(1, pack):
        tot_s = tot_s + pltpu.roll(s, shift=c * feat, axis=1)
        tot_sq = tot_sq + pltpu.roll(sq, shift=c * feat, axis=1)

    mean = tot_s * inv_n
    var = jnp.maximum(tot_sq * inv_n - mean * mean, 0.0)  # biased var, clamp >= 0
    inv_std = lax.rsqrt(var + _EPS)
    scale = gamma_ref[...] * inv_std                      # folded affine
    bias = beta_ref[...] - mean * scale
    o_ref[...] = (x * scale + bias).astype(o_ref.dtype)


# --------------------------------------------------------------------------
# Tiled path, pass 1: per-feature sum / sum-of-squares over row tiles.
# --------------------------------------------------------------------------
def _bn_stats_kernel(x_ref, sum_ref, sumsq_ref, *, n_rows, tile_n):
    i = pl.program_id(1)          # row-tile index (innermost, reduction axis)

    @pl.when(i == 0)
    def _init():
        sum_ref[...] = jnp.zeros_like(sum_ref)
        sumsq_ref[...] = jnp.zeros_like(sumsq_ref)

    x = x_ref[...].astype(jnp.float32)                    # (tile_n, tile_d)
    row = lax.broadcasted_iota(jnp.int32, x.shape, 0) + i * tile_n
    x = jnp.where(row < n_rows, x, 0.0)                   # mask partial last tile
    sum_ref[...] += jnp.sum(x, axis=0, keepdims=True)
    sumsq_ref[...] += jnp.sum(x * x, axis=0, keepdims=True)


# --------------------------------------------------------------------------
# Tiled path, pass 2: y = x * scale + bias (scale/bias precomputed once).
# --------------------------------------------------------------------------
def _bn_apply_kernel(x_ref, scale_ref, bias_ref, o_ref):
    x = x_ref[...].astype(jnp.float32)
    o_ref[...] = (x * scale_ref[...] + bias_ref[...]).astype(o_ref.dtype)


# --------------------------------------------------------------------------
# Wrappers
# --------------------------------------------------------------------------
def _fused_call(xp, gamma, beta, *, pack, n_true):
    Np, Dp = xp.shape
    D = Dp // pack
    gamma_p = jnp.tile(gamma, pack).reshape(1, Dp)
    beta_p = jnp.tile(beta, pack).reshape(1, Dp)
    kernel = functools.partial(
        _bn_fused_kernel, inv_n=1.0 / n_true, pack=pack, feat=D)
    return pl.pallas_call(
        kernel,
        out_shape=jax.ShapeDtypeStruct((Np, Dp), xp.dtype),
        grid=(1,),
        in_specs=[
            pl.BlockSpec((Np, Dp), lambda i: (0, 0)),
            pl.BlockSpec((1, Dp), lambda i: (0, 0)),
            pl.BlockSpec((1, Dp), lambda i: (0, 0)),
        ],
        out_specs=pl.BlockSpec((Np, Dp), lambda i: (0, 0)),
        compiler_params=pltpu.CompilerParams(
            dimension_semantics=("arbitrary",)),
    )(xp, gamma_p, beta_p)


def _tiled_call(xp, gamma, beta, *, pack, n_true):
    Np, Dp = xp.shape
    D = Dp // pack

    # Lane tile: keep 128-lane-dense tiles; split wide Dp (megacore + VMEM).
    if Dp > 512 and Dp % 512 == 0:
        tile_d = 512
    elif Dp > 256 and Dp % 256 == 0:
        tile_d = 256
    elif Dp > 128 and Dp % 128 == 0:
        tile_d = 128
    else:
        tile_d = Dp
    n_d = Dp // tile_d

    # Row tile: large tiles for DMA/compute overlap; partial last tile masked.
    tile_n = 1024 if Np >= 1024 else _round_up(Np, 8)
    n_r = -(-Np // tile_n)

    # Pass 1: accumulate per-lane sum / sumsq across row tiles.
    stats_kernel = functools.partial(_bn_stats_kernel, n_rows=Np, tile_n=tile_n)
    sums, sumsqs = pl.pallas_call(
        stats_kernel,
        out_shape=(jax.ShapeDtypeStruct((1, Dp), jnp.float32),
                   jax.ShapeDtypeStruct((1, Dp), jnp.float32)),
        grid=(n_d, n_r),
        in_specs=[pl.BlockSpec((tile_n, tile_d), lambda j, i: (i, j))],
        out_specs=(pl.BlockSpec((1, tile_d), lambda j, i: (0, j)),
                   pl.BlockSpec((1, tile_d), lambda j, i: (0, j))),
        compiler_params=pltpu.CompilerParams(
            dimension_semantics=("parallel", "arbitrary")),
    )(xp)

    # Tiny (D,)-sized math in plain JAX: fold lane chunks, folded scale/bias.
    s = jnp.sum(sums.reshape(pack, D), axis=0)
    sq = jnp.sum(sumsqs.reshape(pack, D), axis=0)
    mean = s / n_true
    var = jnp.maximum(sq / n_true - mean * mean, 0.0)
    inv_std = lax.rsqrt(var + _EPS)
    scale = gamma * inv_std
    bias = beta - mean * scale
    scale_p = jnp.tile(scale, pack).reshape(1, Dp)
    bias_p = jnp.tile(bias, pack).reshape(1, Dp)

    # Pass 2: normalize, all tiles independent.
    return pl.pallas_call(
        _bn_apply_kernel,
        out_shape=jax.ShapeDtypeStruct((Np, Dp), xp.dtype),
        grid=(n_r, n_d),
        in_specs=[
            pl.BlockSpec((tile_n, tile_d), lambda i, j: (i, j)),
            pl.BlockSpec((1, tile_d), lambda i, j: (0, j)),
            pl.BlockSpec((1, tile_d), lambda i, j: (0, j)),
        ],
        out_specs=pl.BlockSpec((tile_n, tile_d), lambda i, j: (i, j)),
        compiler_params=pltpu.CompilerParams(
            dimension_semantics=("parallel", "parallel")),
    )(xp, scale_p, bias_p)


def normalization_forward(x, gamma, beta):
    """Equivalent of Normalization.forward with a BatchNorm1d normalizer.

    x: (B, S, D); gamma, beta: (D,).  Returns (B, S, D).
    """
    B, S, D = x.shape
    N = B * S
    x2 = x.reshape(N, D)
    gamma = gamma.astype(jnp.float32)
    beta = beta.astype(jnp.float32)

    # Lane packing: (N, D) -> (N/P, P*D = 128) when D divides 128 evenly so
    # the last dim fills all 128 lanes (per-feature stats are folded later).
    pack = 1
    if D < _LANES and _LANES % D == 0 and N % (_LANES // D) == 0:
        pack = _LANES // D
    Np, Dp = N // pack, D * pack
    xp = x2.reshape(Np, Dp)

    if Np * Dp * x.dtype.itemsize <= _FUSED_MAX_BYTES:
        out = _fused_call(xp, gamma, beta, pack=pack, n_true=N)
    else:
        out = _tiled_call(xp, gamma, beta, pack=pack, n_true=N)
    return out.reshape(B, S, D)


def _reference(x, gamma, beta):
    B, S, D = x.shape
    x2 = x.reshape(-1, D).astype(jnp.float32)
    mean = jnp.mean(x2, axis=0, keepdims=True)
    var = jnp.mean((x2 - mean) ** 2, axis=0, keepdims=True)
    y = (x2 - mean) / jnp.sqrt(var + _EPS) * gamma[None, :] + beta[None, :]
    return y.reshape(B, S, D).astype(x.dtype)


if __name__ == "__main__":
    key = jax.random.PRNGKey(0)
    kx, kg, kb, kx2 = jax.random.split(key, 4)

    # Small shapes consistent with the TSP nets: batch=2, graph_size=8,
    # embed_dim=32.  Exercises the fused, lane-packed path.
    B, S, D = 2, 8, 32
    x = jax.random.normal(kx, (B, S, D), dtype=jnp.float32)
    stdv = 1.0 / math.sqrt(D)  # init_parameters(): uniform(-stdv, stdv)
    gamma = jax.random.uniform(kg, (D,), minval=-stdv, maxval=stdv,
                               dtype=jnp.float32)
    beta = jax.random.uniform(kb, (D,), minval=-stdv, maxval=stdv,
                              dtype=jnp.float32)

    out = jax.block_until_ready(normalization_forward(x, gamma, beta))
    ref = _reference(x, gamma, beta)
    assert out.shape == (B, S, D)
    assert jnp.allclose(out, ref, atol=1e-4, rtol=1e-4), "fused path mismatch"

    # Slightly larger case exercising the tiled two-pass path
    # (lane packing + partial last row tile masking).
    B2, S2, D2 = 25, 100, 64
    x2 = jax.random.normal(kx2, (B2, S2, D2), dtype=jnp.float32)
    g2 = jnp.full((D2,), 0.5, dtype=jnp.float32)
    b2 = jnp.full((D2,), 0.1, dtype=jnp.float32)
    out2 = jax.block_until_ready(normalization_forward(x2, g2, b2))
    ref2 = _reference(x2, g2, b2)
    assert jnp.allclose(out2, ref2, atol=1e-4, rtol=1e-4), "tiled path mismatch"

    print("KERNEL_OK")
</pallas_src>

<mosaic_0001>
module attributes {stable_mosaic.version = 11 : i64} {
  func.func @_bn_fused_kernel(%arg0: i32, %arg1: memref<4x128xf32, #tpu.memory_space<vmem>>, %arg2: memref<1x128xf32, #tpu.memory_space<vmem>>, %arg3: memref<1x128xf32, #tpu.memory_space<vmem>>, %arg4: memref<4x128xf32, #tpu.memory_space<vmem>>) attributes {dimension_semantics = [#tpu.dimension_semantics<arbitrary>], iteration_bounds = array<i64: 1>, scalar_prefetch = 0 : i64, scratch_operands = 0 : i64, tpu.core_type = #tpu.core_type<tc>, window_params = [{pipeline_mode = #tpu.pipeline_mode<synchronous>, transform_indices = @transform_0, window_bounds = array<i64: 4, 128>}, {pipeline_mode = #tpu.pipeline_mode<synchronous>, transform_indices = @transform_1, window_bounds = array<i64: 1, 128>}, {pipeline_mode = #tpu.pipeline_mode<synchronous>, transform_indices = @transform_2, window_bounds = array<i64: 1, 128>}, {pipeline_mode = #tpu.pipeline_mode<synchronous>, transform_indices = @transform_3, window_bounds = array<i64: 4, 128>}]} {
    %c0 = arith.constant 0 : index
    %c0_0 = arith.constant 0 : index
    %0 = vector.load %arg1[%c0, %c0_0] : memref<4x128xf32, #tpu.memory_space<vmem>>, vector<4x128xf32>
    %cst = arith.constant dense<0.000000e+00> : vector<128xf32>
    %1 = vector.multi_reduction <add>, %0, %cst [0] : vector<4x128xf32> to vector<128xf32>
    %2 = vector.shape_cast %1 : vector<128xf32> to vector<1x128xf32>
    %3 = arith.mulf %0, %0 : vector<4x128xf32>
    %cst_1 = arith.constant dense<0.000000e+00> : vector<128xf32>
    %4 = vector.multi_reduction <add>, %3, %cst_1 [0] : vector<4x128xf32> to vector<128xf32>
    %5 = vector.shape_cast %4 : vector<128xf32> to vector<1x128xf32>
    %c32_i32 = arith.constant 32 : i32
    %6 = tpu.dynamic_rotate %2 by %c32_i32 dim 1 : vector<1x128xf32>, i32 -> vector<1x128xf32>
    %7 = arith.addf %2, %6 : vector<1x128xf32>
    %c32_i32_2 = arith.constant 32 : i32
    %8 = tpu.dynamic_rotate %5 by %c32_i32_2 dim 1 : vector<1x128xf32>, i32 -> vector<1x128xf32>
    %9 = arith.addf %5, %8 : vector<1x128xf32>
    %c64_i32 = arith.constant 64 : i32
    %10 = tpu.dynamic_rotate %2 by %c64_i32 dim 1 : vector<1x128xf32>, i32 -> vector<1x128xf32>
    %11 = arith.addf %7, %10 : vector<1x128xf32>
    %c64_i32_3 = arith.constant 64 : i32
    %12 = tpu.dynamic_rotate %5 by %c64_i32_3 dim 1 : vector<1x128xf32>, i32 -> vector<1x128xf32>
    %13 = arith.addf %9, %12 : vector<1x128xf32>
    %c96_i32 = arith.constant 96 : i32
    %14 = tpu.dynamic_rotate %2 by %c96_i32 dim 1 : vector<1x128xf32>, i32 -> vector<1x128xf32>
    %15 = arith.addf %11, %14 : vector<1x128xf32>
    %c96_i32_4 = arith.constant 96 : i32
    %16 = tpu.dynamic_rotate %5 by %c96_i32_4 dim 1 : vector<1x128xf32>, i32 -> vector<1x128xf32>
    %17 = arith.addf %13, %16 : vector<1x128xf32>
    %cst_5 = arith.constant 6.250000e-02 : f32
    %18 = vector.broadcast %cst_5 : f32 to vector<1x128xf32>
    %19 = arith.mulf %15, %18 : vector<1x128xf32>
    %cst_6 = arith.constant 6.250000e-02 : f32
    %20 = vector.broadcast %cst_6 : f32 to vector<1x128xf32>
    %21 = arith.mulf %17, %20 : vector<1x128xf32>
    %22 = arith.mulf %19, %19 : vector<1x128xf32>
    %23 = arith.subf %21, %22 : vector<1x128xf32>
    %cst_7 = arith.constant 0.000000e+00 : f32
    %24 = vector.broadcast %cst_7 : f32 to vector<1x128xf32>
    %25 = arith.maximumf %23, %24 : vector<1x128xf32>
    %cst_8 = arith.constant 9.99999974E-6 : f32
    %26 = vector.broadcast %cst_8 : f32 to vector<1x128xf32>
    %27 = arith.addf %25, %26 : vector<1x128xf32>
    %28 = math.rsqrt %27 : vector<1x128xf32>
    %c0_9 = arith.constant 0 : index
    %c0_10 = arith.constant 0 : index
    %29 = vector.load %arg2[%c0_9, %c0_10] : memref<1x128xf32, #tpu.memory_space<vmem>>, vector<1x128xf32>
    %30 = arith.mulf %29, %28 : vector<1x128xf32>
    %c0_11 = arith.constant 0 : index
    %c0_12 = arith.constant 0 : index
    %31 = vector.load %arg3[%c0_11, %c0_12] : memref<1x128xf32, #tpu.memory_space<vmem>>, vector<1x128xf32>
    %32 = arith.mulf %19, %30 : vector<1x128xf32>
    %33 = arith.subf %31, %32 : vector<1x128xf32>
    %34 = vector.broadcast %30 : vector<1x128xf32> to vector<4x128xf32>
    %35 = arith.mulf %0, %34 : vector<4x128xf32>
    %36 = vector.broadcast %33 : vector<1x128xf32> to vector<4x128xf32>
    %37 = arith.addf %35, %36 : vector<4x128xf32>
    %c0_13 = arith.constant 0 : index
    %c0_14 = arith.constant 0 : index
    %38 = vector.load %arg4[%c0_13, %c0_14] : memref<4x128xf32, #tpu.memory_space<vmem>>, vector<4x128xf32>
    tpu.vector_store %arg4[%c0_13, %c0_14], %37 {strides = array<i32>} : memref<4x128xf32, #tpu.memory_space<vmem>>, vector<4x128xf32>,
    return
  }
  func.func @transform_0(%arg0: i32) -> (i32, i32) {
    %c0_i32 = arith.constant 0 : i32
    %c0_i32_0 = arith.constant 0 : i32
    %c0_i32_1 = arith.constant 0 : i32
    return %c0_i32, %c0_i32_0 : i32, i32
  }
  func.func @transform_1(%arg0: i32) -> (i32, i32) {
    %c0_i32 = arith.constant 0 : i32
    %c0_i32_0 = arith.constant 0 : i32
    %c0_i32_1 = arith.constant 0 : i32
    return %c0_i32, %c0_i32_0 : i32, i32
  }
  func.func @transform_2(%arg0: i32) -> (i32, i32) {
    %c0_i32 = arith.constant 0 : i32
    %c0_i32_0 = arith.constant 0 : i32
    %c0_i32_1 = arith.constant 0 : i32
    return %c0_i32, %c0_i32_0 : i32, i32
  }
  func.func @transform_3(%arg0: i32) -> (i32, i32) {
    %c0_i32 = arith.constant 0 : i32
    %c0_i32_0 = arith.constant 0 : i32
    %c0_i32_1 = arith.constant 0 : i32
    return %c0_i32, %c0_i32_0 : i32, i32
  }
}

</mosaic_0001>

<bundles_post_ra>
// kernel: tpu_custom_call.1
= control target key start
LH: loop header
LB: loop body
LE: loop exit
PB: predicated region body
PF: predicated region fallthrough
CT: control target
= control target key end

     0   :  { %8 = vsyncpa [#allocation3], 0  ;;  %s214_s0 = inlined_call_operand.hbm [shape: f32[4,128], index: 0, kind: input, shape index: {}]   ;;  %s215_s1 = inlined_call_operand.vmem [shape: f32[1,128], index: 1, kind: input, shape index: {}]   ;;  %s216_s2 = inlined_call_operand.vmem [shape: f32[1,128], index: 2, kind: input, shape index: {}]   ;;  %s217_s3 = inlined_call_operand.hbm [shape: f32[4,128], index: 3, kind: output, shape index: {}]  }
   0x1   :  { %9 = vsyncpa [#allocation4], 0  ;;  %s159_s12 = smov [#allocation2]   ;;  %s111_s16 = scalar_lea.hbm %s214_s0, 64 }
   0x2   :  { %s16_s13 = sshll.u32 %s159_s12, 4  ;;  %p112_p0 = scmp.ne.s32.totalorder %s214_s0, %s111_s16  ;;  %s17_s13 = int_to_ptr.vmem [resolvable:$true] %s16_s13 }
   0x3   :  { %p115_p1 = scmp.lt.u32.totalorder %s111_s16, %s214_s0 }
   0x5   :  { %p117_p2 = pnand %p115_p1, %p112_p0 }
   0x7   :  { %120 = shalt.err (!%p117_p2)
}
   0x8   :  { %s121_s21 = scalar_lea.vmem %s17_s13, 64  ;;  %p126_p4 = scmp.lt.s32.totalorder %s17_s13, %s17_s13 }
   0x9   :  { %p122_p3 = scmp.ne.s32.totalorder %s17_s13, %s121_s21  ;;  %p127_p5 = scmp.lt.s32.totalorder %s121_s21, %s121_s21 }
   0xb   :  { %p128_p6 = por %p127_p5, %p126_p4 }
   0xd   :  { %p129_p7 = pnand %p128_p6, %p122_p3 }
   0xf   :  { %132 = shalt.err (!%p129_p7)
}
  0x10   :  { %19 = dma.hbm_to_vmem [thread:$0]  %s214_s0, 64, %s17_s13, [#allocation3]  }
  0x11   :  { %155 = dma.done.wait [#allocation3], 64  }
  0x12   :  { %156 = vsyncadd [#allocation3], 4294967232  ;;  %vm28_vm0 = vcmask 1043456   ;;  %v27_v0 = vld [vmem:[#allocation2] sm:$0xf]  ;;  %s160_s24 = smov 64   ;;  %v75_v34 = vlaneseq }
  0x13   :  { %v29_v1 = vsel %vm28_vm0, %v27_v0, 0.0  ;;  %v36_v2 = vmul.f32 %v27_v0, %v27_v0  ;;  %s161_s0 = smov 32   ;;  %s162_s25 = smov 96   ;;  %v69_v36 = vld [vmem:[%s215_s1] sm:$0x1] }
  0x14   :  { %v30_v3 = vrot.slane %v29_v1, 4  ;;  %v76_v35 = vshrl.u32 %v75_v34, 7  ;;  %v71_v40 = vld [vmem:[%s216_s2] sm:$0x1]  ;;  %s163_s30 = smov [#allocation5]  }
  0x15   :  { %v37_v4 = vsel %vm28_vm0, %v36_v2, 0.0  ;;  %s95_s4 = sshll.u32 %s163_s30, 4  ;;  %s96_s4 = int_to_ptr.vmem [resolvable:$true] %s95_s4 }
  0x16   :  { %v31_v5 = vadd.f32 %v30_v3, %v29_v1  ;;  %v38_v6 = vrot.slane %v37_v4, 4  ;;  %v77_v37 = vsub.s32 0, %v76_v35  ;;  %s133_s5 = scalar_lea.vmem %s96_s4, 64  ;;  %p138_p9 = scmp.lt.s32.totalorder %s96_s4, %s96_s4 }
  0x17   :  { %p134_p8 = scmp.ne.s32.totalorder %s96_s4, %s133_s5  ;;  %p139_p10 = scmp.lt.s32.totalorder %s133_s5, %s133_s5 }
  0x18   :  { %v32_v7 = vrot.slane %v31_v5, 2  ;;  %v39_v8 = vadd.f32 %v38_v6, %v37_v4 }
  0x19   :  { %p140_p11 = por %p139_p10, %p138_p9 }
  0x1a   :  { %v33_v9 = vadd.f32 %v32_v7, %v31_v5  ;;  %v40_v10 = vrot.slane %v39_v8, 2 }
  0x1b   :  { %p141_p12 = pnand %p140_p11, %p134_p8 }
  0x1c   :  { %v34_v11 = vrot.slane %v33_v9, 1  ;;  %v41_v12 = vadd.f32 %v40_v10, %v39_v8 }
  0x1e   :  { %v35_v13 = vadd.f32 %v34_v11, %v33_v9  ;;  %v42_v14 = vrot.slane %v41_v12, 1 }
  0x20   :  { %50 = vrot.lane.b32.xlu1 %v35_v13, %s160_s24  ;;  %44 = vrot.lane.b32.xlu0 %v35_v13, %s161_s0  ;;  %v43_v15 = vadd.f32 %v42_v14, %v41_v12 }
  0x24   :  { %53 = vrot.lane.b32.xlu1 %v43_v15, %s160_s24  ;;  %47 = vrot.lane.b32.xlu0 %v43_v15, %s161_s0 }
  0x28   :  { %59 = vrot.lane.b32.xlu1 %v43_v15, %s162_s25  ;;  %56 = vrot.lane.b32.xlu0 %v35_v13, %s162_s25 }
  0x92   :  { %v51_v16 = vpop.permute.xlu1 %50  ;;  %v45_v17 = vpop.permute.xlu0 %44 }
  0x93   :  { %v46_v18 = vadd.f32 %v45_v17, %v35_v13 }
  0x95   :  { %v52_v23 = vadd.f32 %v51_v16, %v46_v18 }
  0x96   :  { %v54_v19 = vpop.permute.xlu1 %53  ;;  %v48_v20 = vpop.permute.xlu0 %47 }
  0x97   :  { %v49_v21 = vadd.f32 %v48_v20, %v43_v15 }
  0x99   :  { %v55_v22 = vadd.f32 %v54_v19, %v49_v21 }
  0x9a   :  { %v60_v24 = vpop.permute.xlu1 %59  ;;  %v57_v25 = vpop.permute.xlu0 %56 }
  0x9b   :  { %v61_v26 = vadd.f32 %v60_v24, %v55_v22  ;;  %v58_v27 = vadd.f32 %v57_v25, %v52_v23 }
  0x9d   :  { %v62_v28 = vmul.f32 0.0625, %v58_v27  ;;  %v63_v29 = vmul.f32 0.0625, %v61_v26 }
  0x9f   :  { %v64_v30 = vmul.f32 %v62_v28, %v62_v28 }
  0xa1   :  { %v65_v31 = vsub.f32 %v63_v29, %v64_v30 }
  0xa3   :  { %v66_v32 = vmax.f32 %v65_v31, 0.0 }
  0xa5   :  { %v67_v33 = vadd.f32 1e-05, %v66_v32 }
  0xa7   :  { %109 = vrsqrt.f32 %v67_v33 }
  0xb1   :  { %v110_v38 = vpop.eup %109 }
  0xb2   :  { %v70_v39 = vmul.f32 %v110_v38, %v69_v36 }
  0xb4   :  { %v72_v41 = vmul.f32 %v70_v39, %v62_v28  ;;  %v78_v42 = vrot.slane %v70_v39, %v77_v37 }
  0xb6   :  { %v73_v43 = vsub.f32 %v71_v40, %v72_v41  ;;  %v80_v44 = vmul.f32 %v78_v42, %v27_v0 }
  0xb8   :  { %v85_v45 = vrot.slane %v73_v43, %v77_v37 }
  0xba   :  { %v87_v46 = vadd.f32 %v85_v45, %v80_v44 }
  0xbc   :  { %88 = vst [vmem:[#allocation5] sm:$0xf] %v87_v46 }
  0xbd   :  { %144 = shalt.err (!%p141_p12)
}
  0xbe   :  { %s145_s2 = scalar_lea.hbm %s217_s3, 64 }
  0xbf   :  { %p146_p13 = scmp.ne.s32.totalorder %s217_s3, %s145_s2  ;;  %p149_p0 = scmp.lt.u32.totalorder %s145_s2, %s217_s3 }
  0xc1   :  { %p151_p1 = pnand %p149_p0, %p146_p13 }
  0xc3   :  { %154 = shalt.err (!%p151_p1)
}
  0xc4   :  { %98 = dma.vmem_to_hbm [thread:$0]  %s96_s4, 64, %s217_s3, [#allocation4]  }
  0xc5   :  { %157 = dma.done.wait [#allocation4], 64  }
  0xc6   :  { %158 = vsyncadd [#allocation4], 4294967232 }
  0xc7   :  { %102 = vsyncpa [#allocation3], 1 }
  0xc8   :  { %103 = vsyncpa [#allocation4], 1 }

</bundles_post_ra>
